<compile_context>
chip_gen: v6e
topology: v6e:2x2x1
jax: 0.10.0
libtpu: 0.0.40
codegen_flags: <defaults>
</compile_context>

<pallas_src>
import functools

import jax
import jax.numpy as jnp
from jax import lax
from jax.experimental import pallas as pl
from jax.experimental.pallas import tpu as pltpu  # noqa: F401  (kept for TPU-specific extensions)


def _round_up(v, m):
    return ((v + m - 1) // m) * m


def attention_kernel(x_ref, wqkv_ref, wout_ref, bo_ref, o_ref, *, batch, seq, heads, dim_head):
    """Single-invocation fused attention.

    x_ref    : (batch*seq, dim)        f32
    wqkv_ref : (dim, 3*inner)          bf16 (perf path) or f32 (validation path);
               Q columns pre-scaled by dim_head**-0.5
    wout_ref : (inner, dim_pad)        same dtype as wqkv_ref; zero-padded to 128 lanes
    bo_ref   : (1, dim_pad)            f32, zero-padded
    o_ref    : (batch*seq, dim_pad)    f32
    """
    inner = heads * dim_head
    cdt = wqkv_ref.dtype                     # MXU operand dtype (bf16 perf / f32 validation)

    x = x_ref[...].astype(cdt)                                           # (B*N, dim)

    # One wide QKV projection; result produced directly in the MXU operand dtype.
    qkv = jnp.dot(x, wqkv_ref[...], preferred_element_type=cdt)          # (B*N, 3*inner)

    out_rows = []
    for b in range(batch):                                               # static unroll (B small)
        r0 = b * seq
        head_outs = []
        for h in range(heads):                                           # static unroll
            c = h * dim_head
            q = qkv[r0:r0 + seq, c:c + dim_head]                         # (seq, dh), scale folded in
            k = qkv[r0:r0 + seq, inner + c:inner + c + dim_head]         # (seq, dh)
            v = qkv[r0:r0 + seq, 2 * inner + c:2 * inner + c + dim_head]  # (seq, dh)

            # dots = q @ k^T, f32 accumulate
            dots = lax.dot_general(q, k, (((1,), (1,)), ((), ())),
                                   preferred_element_type=jnp.float32)   # (seq, seq)

            # single f32 softmax (reference has no mask)
            m = jnp.max(dots, axis=-1, keepdims=True)
            e = jnp.exp(dots - m)
            attn = (e / jnp.sum(e, axis=-1, keepdims=True)).astype(cdt)

            head_outs.append(jnp.dot(attn, v, preferred_element_type=cdt))   # (seq, dh)

        # '(h d)' concat -> rows of W_out are (head-major, dim_head-minor)
        out_rows.append(jnp.concatenate(head_outs, axis=-1))             # (seq, inner)

    o_cat = jnp.concatenate(out_rows, axis=0)                            # (B*N, inner)

    # One fused output projection (K=inner) into the 128-lane-padded output; f32 accumulate.
    y = jnp.dot(o_cat, wout_ref[...], preferred_element_type=jnp.float32)  # (B*N, dim_pad)
    o_ref[...] = (y + bo_ref[...]).astype(o_ref.dtype)


def prepare_attention_params(wqkv, wout, bout, *, heads, dim_head, param_dtype=jnp.bfloat16):
    """One-time host-side weight prep.

    wqkv : (dim, 3*inner)  so that qkv = x @ wqkv  (== torch x @ W_qkv.T; chunk(3) is q|k|v,
                            each head-major inside, so no column reordering is needed)
    wout : (inner, dim)    so that y   = o @ wout  (== torch o @ W_out.T)
    bout : (dim,)
    """
    dim = wqkv.shape[0]
    inner = heads * dim_head
    dim_pad = _round_up(max(dim, 128), 128)      # lane-dense output width

    # Fold the attention scale into the Q columns. Exact when dim_head is a power of two
    # (scale is a power of two, e.g. 16**-0.5 = 0.25); for other dim_head values this adds
    # one extra rounding step before the cast to param_dtype (negligible, but intentional).
    scale = dim_head ** (-0.5)
    wqkv_scaled = wqkv.astype(jnp.float32).at[:, :inner].multiply(scale)

    wout_pad = jnp.zeros((inner, dim_pad), jnp.float32).at[:, :dim].set(wout.astype(jnp.float32))
    bo_pad = jnp.zeros((1, dim_pad), jnp.float32).at[:, :dim].set(bout.astype(jnp.float32))

    return dict(
        wqkv=wqkv_scaled.astype(param_dtype),
        wout=wout_pad.astype(param_dtype),
        bo=bo_pad,                               # bias stays f32 (added after f32 accumulate)
    )


def attention(x, params, *, heads, dim_head):
    b, n, dim = x.shape
    dim_pad = params["wout"].shape[1]
    kernel = functools.partial(attention_kernel, batch=b, seq=n, heads=heads, dim_head=dim_head)

    # No grid: the whole problem (a few KB) is one kernel invocation; inputs/outputs live
    # fully in VMEM. (On v7x a grid=(B,) "parallel" split costs more in launch/sync than the
    # 2x compute split saves at these sizes.)
    out_pad = pl.pallas_call(
        kernel,
        out_shape=jax.ShapeDtypeStruct((b * n, dim_pad), jnp.float32),
    )(x.reshape(b * n, dim), params["wqkv"], params["wout"], params["bo"])

    return out_pad[:, :dim].reshape(b, n, dim).astype(x.dtype)


def attention_reference(x, wqkv, wout, bout, *, heads, dim_head):
    """Pure-JAX f32 reference of the PyTorch module's forward."""
    b, n, dim = x.shape
    scale = dim_head ** (-0.5)
    qkv = jnp.einsum("bnd,de->bne", x, wqkv)
    q, k, v = jnp.split(qkv, 3, axis=-1)

    def to_heads(t):
        return t.reshape(b, n, heads, dim_head).transpose(0, 2, 1, 3)

    q, k, v = map(to_heads, (q, k, v))
    dots = jnp.einsum("bhid,bhjd->bhij", q, k) * scale
    attn = jax.nn.softmax(dots, axis=-1)
    o = jnp.einsum("bhij,bhjd->bhid", attn, v)
    o = o.transpose(0, 2, 1, 3).reshape(b, n, heads * dim_head)
    return jnp.einsum("bnd,de->bne", o, wout) + bout


if __name__ == "__main__":
    # Small shapes consistent with the module: x is (batch, seq, dim)
    B, N, DIM = 2, 8, 32
    HEADS, DIM_HEAD = 4, 16
    INNER = HEADS * DIM_HEAD

    key = jax.random.PRNGKey(0)
    kx, kw1, kw2, kb = jax.random.split(key, 4)
    x = jax.random.normal(kx, (B, N, DIM), jnp.float32)
    wqkv = jax.random.normal(kw1, (DIM, 3 * INNER), jnp.float32) / jnp.sqrt(DIM)
    wout = jax.random.normal(kw2, (INNER, DIM), jnp.float32) / jnp.sqrt(INNER)
    bout = 0.1 * jax.random.normal(kb, (DIM,), jnp.float32)

    ref = attention_reference(x, wqkv, wout, bout, heads=HEADS, dim_head=DIM_HEAD)

    # 1) Structural validation: all-f32 kernel variant, tighter tolerance.
    params_f32 = prepare_attention_params(wqkv, wout, bout, heads=HEADS, dim_head=DIM_HEAD,
                                          param_dtype=jnp.float32)
    out_f32 = attention(x, params_f32, heads=HEADS, dim_head=DIM_HEAD)
    jax.block_until_ready(out_f32)
    err_f32 = float(jnp.max(jnp.abs(out_f32 - ref)))
    assert jnp.allclose(out_f32, ref, atol=3e-2, rtol=3e-2), f"f32 variant max abs err {err_f32}"

    # 2) Performance path: bf16 MXU operands, f32 accumulate / softmax.
    params = prepare_attention_params(wqkv, wout, bout, heads=HEADS, dim_head=DIM_HEAD,
                                      param_dtype=jnp.bfloat16)
    out = attention(x, params, heads=HEADS, dim_head=DIM_HEAD)
    jax.block_until_ready(out)

    assert out.shape == (B, N, DIM) and out.dtype == jnp.float32
    err_bf16 = float(jnp.max(jnp.abs(out - ref)))
    assert jnp.allclose(out, ref, atol=1e-1, rtol=1e-1), f"bf16 variant max abs err {err_bf16}"
    print("KERNEL_OK")
</pallas_src>

<mosaic_0001>
module attributes {stable_mosaic.version = 11 : i64} {
  func.func @attention_kernel(%arg0: memref<16x32xf32, #tpu.memory_space<vmem>>, %arg1: memref<32x192xf32, #tpu.memory_space<vmem>>, %arg2: memref<64x128xf32, #tpu.memory_space<vmem>>, %arg3: memref<1x128xf32, #tpu.memory_space<vmem>>, %arg4: memref<16x128xf32, #tpu.memory_space<vmem>>) attributes {dimension_semantics = [], scalar_prefetch = 0 : i64, scratch_operands = 0 : i64, tpu.core_type = #tpu.core_type<tc>} {
    %c0 = arith.constant 0 : index
    %c0_0 = arith.constant 0 : index
    %0 = vector.load %arg0[%c0, %c0_0] : memref<16x32xf32, #tpu.memory_space<vmem>>, vector<16x32xf32>
    %c0_1 = arith.constant 0 : index
    %c0_2 = arith.constant 0 : index
    %1 = vector.load %arg1[%c0_1, %c0_2] : memref<32x192xf32, #tpu.memory_space<vmem>>, vector<32x192xf32>
    %cst = arith.constant dense<0.000000e+00> : vector<16x192xf32>
    %2 = tpu.matmul %0, %1, %cst {dimension_numbers = #tpu.dot_dimension_numbers<[1], [0], [0], [1], [0, 0, 1, 1], [], []>} : vector<16x32xf32>, vector<32x192xf32>, vector<16x192xf32> -> vector<16x192xf32>
    %3 = vector.extract_strided_slice %2 {offsets = [0, 0], sizes = [8, 16], strides = [1, 1]} : vector<16x192xf32> to vector<8x16xf32>
    %4 = vector.extract_strided_slice %2 {offsets = [0, 64], sizes = [8, 16], strides = [1, 1]} : vector<16x192xf32> to vector<8x16xf32>
    %5 = vector.extract_strided_slice %2 {offsets = [0, 128], sizes = [8, 16], strides = [1, 1]} : vector<16x192xf32> to vector<8x16xf32>
    %cst_3 = arith.constant dense<0.000000e+00> : vector<8x8xf32>
    %6 = tpu.matmul %3, %4, %cst_3 {dimension_numbers = #tpu.dot_dimension_numbers<[1], [1], [0], [0], [0, 0, 1, 0], [], []>} : vector<8x16xf32>, vector<8x16xf32>, vector<8x8xf32> -> vector<8x8xf32>
    %cst_4 = arith.constant dense<0xFF800000> : vector<8xf32>
    %7 = vector.multi_reduction <maximumf>, %6, %cst_4 [1] : vector<8x8xf32> to vector<8xf32>
    %8 = vector.shape_cast %7 : vector<8xf32> to vector<8x1xf32>
    %9 = vector.broadcast %8 : vector<8x1xf32> to vector<8x8xf32>
    %10 = arith.subf %6, %9 : vector<8x8xf32>
    %11 = math.exp %10 : vector<8x8xf32>
    %cst_5 = arith.constant dense<0.000000e+00> : vector<8xf32>
    %12 = vector.multi_reduction <add>, %11, %cst_5 [1] : vector<8x8xf32> to vector<8xf32>
    %13 = vector.shape_cast %12 : vector<8xf32> to vector<8x1xf32>
    %14 = vector.broadcast %13 : vector<8x1xf32> to vector<8x8xf32>
    %15 = arith.divf %11, %14 : vector<8x8xf32>
    %cst_6 = arith.constant dense<0.000000e+00> : vector<8x16xf32>
    %16 = tpu.matmul %15, %5, %cst_6 {dimension_numbers = #tpu.dot_dimension_numbers<[1], [0], [0], [1], [0, 0, 1, 1], [], []>} : vector<8x8xf32>, vector<8x16xf32>, vector<8x16xf32> -> vector<8x16xf32>
    %17 = vector.extract_strided_slice %2 {offsets = [0, 16], sizes = [8, 16], strides = [1, 1]} : vector<16x192xf32> to vector<8x16xf32>
    %18 = vector.extract_strided_slice %2 {offsets = [0, 80], sizes = [8, 16], strides = [1, 1]} : vector<16x192xf32> to vector<8x16xf32>
    %19 = vector.extract_strided_slice %2 {offsets = [0, 144], sizes = [8, 16], strides = [1, 1]} : vector<16x192xf32> to vector<8x16xf32>
    %cst_7 = arith.constant dense<0.000000e+00> : vector<8x8xf32>
    %20 = tpu.matmul %17, %18, %cst_7 {dimension_numbers = #tpu.dot_dimension_numbers<[1], [1], [0], [0], [0, 0, 1, 0], [], []>} : vector<8x16xf32>, vector<8x16xf32>, vector<8x8xf32> -> vector<8x8xf32>
    %cst_8 = arith.constant dense<0xFF800000> : vector<8xf32>
    %21 = vector.multi_reduction <maximumf>, %20, %cst_8 [1] : vector<8x8xf32> to vector<8xf32>
    %22 = vector.shape_cast %21 : vector<8xf32> to vector<8x1xf32>
    %23 = vector.broadcast %22 : vector<8x1xf32> to vector<8x8xf32>
    %24 = arith.subf %20, %23 : vector<8x8xf32>
    %25 = math.exp %24 : vector<8x8xf32>
    %cst_9 = arith.constant dense<0.000000e+00> : vector<8xf32>
    %26 = vector.multi_reduction <add>, %25, %cst_9 [1] : vector<8x8xf32> to vector<8xf32>
    %27 = vector.shape_cast %26 : vector<8xf32> to vector<8x1xf32>
    %28 = vector.broadcast %27 : vector<8x1xf32> to vector<8x8xf32>
    %29 = arith.divf %25, %28 : vector<8x8xf32>
    %cst_10 = arith.constant dense<0.000000e+00> : vector<8x16xf32>
    %30 = tpu.matmul %29, %19, %cst_10 {dimension_numbers = #tpu.dot_dimension_numbers<[1], [0], [0], [1], [0, 0, 1, 1], [], []>} : vector<8x8xf32>, vector<8x16xf32>, vector<8x16xf32> -> vector<8x16xf32>
    %31 = vector.extract_strided_slice %2 {offsets = [0, 32], sizes = [8, 16], strides = [1, 1]} : vector<16x192xf32> to vector<8x16xf32>
    %32 = vector.extract_strided_slice %2 {offsets = [0, 96], sizes = [8, 16], strides = [1, 1]} : vector<16x192xf32> to vector<8x16xf32>
    %33 = vector.extract_strided_slice %2 {offsets = [0, 160], sizes = [8, 16], strides = [1, 1]} : vector<16x192xf32> to vector<8x16xf32>
    %cst_11 = arith.constant dense<0.000000e+00> : vector<8x8xf32>
    %34 = tpu.matmul %31, %32, %cst_11 {dimension_numbers = #tpu.dot_dimension_numbers<[1], [1], [0], [0], [0, 0, 1, 0], [], []>} : vector<8x16xf32>, vector<8x16xf32>, vector<8x8xf32> -> vector<8x8xf32>
    %cst_12 = arith.constant dense<0xFF800000> : vector<8xf32>
    %35 = vector.multi_reduction <maximumf>, %34, %cst_12 [1] : vector<8x8xf32> to vector<8xf32>
    %36 = vector.shape_cast %35 : vector<8xf32> to vector<8x1xf32>
    %37 = vector.broadcast %36 : vector<8x1xf32> to vector<8x8xf32>
    %38 = arith.subf %34, %37 : vector<8x8xf32>
    %39 = math.exp %38 : vector<8x8xf32>
    %cst_13 = arith.constant dense<0.000000e+00> : vector<8xf32>
    %40 = vector.multi_reduction <add>, %39, %cst_13 [1] : vector<8x8xf32> to vector<8xf32>
    %41 = vector.shape_cast %40 : vector<8xf32> to vector<8x1xf32>
    %42 = vector.broadcast %41 : vector<8x1xf32> to vector<8x8xf32>
    %43 = arith.divf %39, %42 : vector<8x8xf32>
    %cst_14 = arith.constant dense<0.000000e+00> : vector<8x16xf32>
    %44 = tpu.matmul %43, %33, %cst_14 {dimension_numbers = #tpu.dot_dimension_numbers<[1], [0], [0], [1], [0, 0, 1, 1], [], []>} : vector<8x8xf32>, vector<8x16xf32>, vector<8x16xf32> -> vector<8x16xf32>
    %45 = vector.extract_strided_slice %2 {offsets = [0, 48], sizes = [8, 16], strides = [1, 1]} : vector<16x192xf32> to vector<8x16xf32>
    %46 = vector.extract_strided_slice %2 {offsets = [0, 112], sizes = [8, 16], strides = [1, 1]} : vector<16x192xf32> to vector<8x16xf32>
    %47 = vector.extract_strided_slice %2 {offsets = [0, 176], sizes = [8, 16], strides = [1, 1]} : vector<16x192xf32> to vector<8x16xf32>
    %cst_15 = arith.constant dense<0.000000e+00> : vector<8x8xf32>
    %48 = tpu.matmul %45, %46, %cst_15 {dimension_numbers = #tpu.dot_dimension_numbers<[1], [1], [0], [0], [0, 0, 1, 0], [], []>} : vector<8x16xf32>, vector<8x16xf32>, vector<8x8xf32> -> vector<8x8xf32>
    %cst_16 = arith.constant dense<0xFF800000> : vector<8xf32>
    %49 = vector.multi_reduction <maximumf>, %48, %cst_16 [1] : vector<8x8xf32> to vector<8xf32>
    %50 = vector.shape_cast %49 : vector<8xf32> to vector<8x1xf32>
    %51 = vector.broadcast %50 : vector<8x1xf32> to vector<8x8xf32>
    %52 = arith.subf %48, %51 : vector<8x8xf32>
    %53 = math.exp %52 : vector<8x8xf32>
    %cst_17 = arith.constant dense<0.000000e+00> : vector<8xf32>
    %54 = vector.multi_reduction <add>, %53, %cst_17 [1] : vector<8x8xf32> to vector<8xf32>
    %55 = vector.shape_cast %54 : vector<8xf32> to vector<8x1xf32>
    %56 = vector.broadcast %55 : vector<8x1xf32> to vector<8x8xf32>
    %57 = arith.divf %53, %56 : vector<8x8xf32>
    %cst_18 = arith.constant dense<0.000000e+00> : vector<8x16xf32>
    %58 = tpu.matmul %57, %47, %cst_18 {dimension_numbers = #tpu.dot_dimension_numbers<[1], [0], [0], [1], [0, 0, 1, 1], [], []>} : vector<8x8xf32>, vector<8x16xf32>, vector<8x16xf32> -> vector<8x16xf32>
    %59 = tpu.concatenate %16, %30, %44, %58 in 1 : vector<8x16xf32>, vector<8x16xf32>, vector<8x16xf32>, vector<8x16xf32> -> vector<8x64xf32>
    %60 = vector.extract_strided_slice %2 {offsets = [8, 0], sizes = [8, 16], strides = [1, 1]} : vector<16x192xf32> to vector<8x16xf32>
    %61 = vector.extract_strided_slice %2 {offsets = [8, 64], sizes = [8, 16], strides = [1, 1]} : vector<16x192xf32> to vector<8x16xf32>
    %62 = vector.extract_strided_slice %2 {offsets = [8, 128], sizes = [8, 16], strides = [1, 1]} : vector<16x192xf32> to vector<8x16xf32>
    %cst_19 = arith.constant dense<0.000000e+00> : vector<8x8xf32>
    %63 = tpu.matmul %60, %61, %cst_19 {dimension_numbers = #tpu.dot_dimension_numbers<[1], [1], [0], [0], [0, 0, 1, 0], [], []>} : vector<8x16xf32>, vector<8x16xf32>, vector<8x8xf32> -> vector<8x8xf32>
    %cst_20 = arith.constant dense<0xFF800000> : vector<8xf32>
    %64 = vector.multi_reduction <maximumf>, %63, %cst_20 [1] : vector<8x8xf32> to vector<8xf32>
    %65 = vector.shape_cast %64 : vector<8xf32> to vector<8x1xf32>
    %66 = vector.broadcast %65 : vector<8x1xf32> to vector<8x8xf32>
    %67 = arith.subf %63, %66 : vector<8x8xf32>
    %68 = math.exp %67 : vector<8x8xf32>
    %cst_21 = arith.constant dense<0.000000e+00> : vector<8xf32>
    %69 = vector.multi_reduction <add>, %68, %cst_21 [1] : vector<8x8xf32> to vector<8xf32>
    %70 = vector.shape_cast %69 : vector<8xf32> to vector<8x1xf32>
    %71 = vector.broadcast %70 : vector<8x1xf32> to vector<8x8xf32>
    %72 = arith.divf %68, %71 : vector<8x8xf32>
    %cst_22 = arith.constant dense<0.000000e+00> : vector<8x16xf32>
    %73 = tpu.matmul %72, %62, %cst_22 {dimension_numbers = #tpu.dot_dimension_numbers<[1], [0], [0], [1], [0, 0, 1, 1], [], []>} : vector<8x8xf32>, vector<8x16xf32>, vector<8x16xf32> -> vector<8x16xf32>
    %74 = vector.extract_strided_slice %2 {offsets = [8, 16], sizes = [8, 16], strides = [1, 1]} : vector<16x192xf32> to vector<8x16xf32>
    %75 = vector.extract_strided_slice %2 {offsets = [8, 80], sizes = [8, 16], strides = [1, 1]} : vector<16x192xf32> to vector<8x16xf32>
    %76 = vector.extract_strided_slice %2 {offsets = [8, 144], sizes = [8, 16], strides = [1, 1]} : vector<16x192xf32> to vector<8x16xf32>
    %cst_23 = arith.constant dense<0.000000e+00> : vector<8x8xf32>
    %77 = tpu.matmul %74, %75, %cst_23 {dimension_numbers = #tpu.dot_dimension_numbers<[1], [1], [0], [0], [0, 0, 1, 0], [], []>} : vector<8x16xf32>, vector<8x16xf32>, vector<8x8xf32> -> vector<8x8xf32>
    %cst_24 = arith.constant dense<0xFF800000> : vector<8xf32>
    %78 = vector.multi_reduction <maximumf>, %77, %cst_24 [1] : vector<8x8xf32> to vector<8xf32>
    %79 = vector.shape_cast %78 : vector<8xf32> to vector<8x1xf32>
    %80 = vector.broadcast %79 : vector<8x1xf32> to vector<8x8xf32>
    %81 = arith.subf %77, %80 : vector<8x8xf32>
    %82 = math.exp %81 : vector<8x8xf32>
    %cst_25 = arith.constant dense<0.000000e+00> : vector<8xf32>
    %83 = vector.multi_reduction <add>, %82, %cst_25 [1] : vector<8x8xf32> to vector<8xf32>
    %84 = vector.shape_cast %83 : vector<8xf32> to vector<8x1xf32>
    %85 = vector.broadcast %84 : vector<8x1xf32> to vector<8x8xf32>
    %86 = arith.divf %82, %85 : vector<8x8xf32>
    %cst_26 = arith.constant dense<0.000000e+00> : vector<8x16xf32>
    %87 = tpu.matmul %86, %76, %cst_26 {dimension_numbers = #tpu.dot_dimension_numbers<[1], [0], [0], [1], [0, 0, 1, 1], [], []>} : vector<8x8xf32>, vector<8x16xf32>, vector<8x16xf32> -> vector<8x16xf32>
    %88 = vector.extract_strided_slice %2 {offsets = [8, 32], sizes = [8, 16], strides = [1, 1]} : vector<16x192xf32> to vector<8x16xf32>
    %89 = vector.extract_strided_slice %2 {offsets = [8, 96], sizes = [8, 16], strides = [1, 1]} : vector<16x192xf32> to vector<8x16xf32>
    %90 = vector.extract_strided_slice %2 {offsets = [8, 160], sizes = [8, 16], strides = [1, 1]} : vector<16x192xf32> to vector<8x16xf32>
    %cst_27 = arith.constant dense<0.000000e+00> : vector<8x8xf32>
    %91 = tpu.matmul %88, %89, %cst_27 {dimension_numbers = #tpu.dot_dimension_numbers<[1], [1], [0], [0], [0, 0, 1, 0], [], []>} : vector<8x16xf32>, vector<8x16xf32>, vector<8x8xf32> -> vector<8x8xf32>
    %cst_28 = arith.constant dense<0xFF800000> : vector<8xf32>
    %92 = vector.multi_reduction <maximumf>, %91, %cst_28 [1] : vector<8x8xf32> to vector<8xf32>
    %93 = vector.shape_cast %92 : vector<8xf32> to vector<8x1xf32>
    %94 = vector.broadcast %93 : vector<8x1xf32> to vector<8x8xf32>
    %95 = arith.subf %91, %94 : vector<8x8xf32>
    %96 = math.exp %95 : vector<8x8xf32>
    %cst_29 = arith.constant dense<0.000000e+00> : vector<8xf32>
    %97 = vector.multi_reduction <add>, %96, %cst_29 [1] : vector<8x8xf32> to vector<8xf32>
    %98 = vector.shape_cast %97 : vector<8xf32> to vector<8x1xf32>
    %99 = vector.broadcast %98 : vector<8x1xf32> to vector<8x8xf32>
    %100 = arith.divf %96, %99 : vector<8x8xf32>
    %cst_30 = arith.constant dense<0.000000e+00> : vector<8x16xf32>
    %101 = tpu.matmul %100, %90, %cst_30 {dimension_numbers = #tpu.dot_dimension_numbers<[1], [0], [0], [1], [0, 0, 1, 1], [], []>} : vector<8x8xf32>, vector<8x16xf32>, vector<8x16xf32> -> vector<8x16xf32>
    %102 = vector.extract_strided_slice %2 {offsets = [8, 48], sizes = [8, 16], strides = [1, 1]} : vector<16x192xf32> to vector<8x16xf32>
    %103 = vector.extract_strided_slice %2 {offsets = [8, 112], sizes = [8, 16], strides = [1, 1]} : vector<16x192xf32> to vector<8x16xf32>
    %104 = vector.extract_strided_slice %2 {offsets = [8, 176], sizes = [8, 16], strides = [1, 1]} : vector<16x192xf32> to vector<8x16xf32>
    %cst_31 = arith.constant dense<0.000000e+00> : vector<8x8xf32>
    %105 = tpu.matmul %102, %103, %cst_31 {dimension_numbers = #tpu.dot_dimension_numbers<[1], [1], [0], [0], [0, 0, 1, 0], [], []>} : vector<8x16xf32>, vector<8x16xf32>, vector<8x8xf32> -> vector<8x8xf32>
    %cst_32 = arith.constant dense<0xFF800000> : vector<8xf32>
    %106 = vector.multi_reduction <maximumf>, %105, %cst_32 [1] : vector<8x8xf32> to vector<8xf32>
    %107 = vector.shape_cast %106 : vector<8xf32> to vector<8x1xf32>
    %108 = vector.broadcast %107 : vector<8x1xf32> to vector<8x8xf32>
    %109 = arith.subf %105, %108 : vector<8x8xf32>
    %110 = math.exp %109 : vector<8x8xf32>
    %cst_33 = arith.constant dense<0.000000e+00> : vector<8xf32>
    %111 = vector.multi_reduction <add>, %110, %cst_33 [1] : vector<8x8xf32> to vector<8xf32>
    %112 = vector.shape_cast %111 : vector<8xf32> to vector<8x1xf32>
    %113 = vector.broadcast %112 : vector<8x1xf32> to vector<8x8xf32>
    %114 = arith.divf %110, %113 : vector<8x8xf32>
    %cst_34 = arith.constant dense<0.000000e+00> : vector<8x16xf32>
    %115 = tpu.matmul %114, %104, %cst_34 {dimension_numbers = #tpu.dot_dimension_numbers<[1], [0], [0], [1], [0, 0, 1, 1], [], []>} : vector<8x8xf32>, vector<8x16xf32>, vector<8x16xf32> -> vector<8x16xf32>
    %116 = tpu.concatenate %73, %87, %101, %115 in 1 : vector<8x16xf32>, vector<8x16xf32>, vector<8x16xf32>, vector<8x16xf32> -> vector<8x64xf32>
    %117 = tpu.concatenate %59, %116 in 0 : vector<8x64xf32>, vector<8x64xf32> -> vector<16x64xf32>
    %c0_35 = arith.constant 0 : index
    %c0_36 = arith.constant 0 : index
    %118 = vector.load %arg2[%c0_35, %c0_36] : memref<64x128xf32, #tpu.memory_space<vmem>>, vector<64x128xf32>
    %cst_37 = arith.constant dense<0.000000e+00> : vector<16x128xf32>
    %119 = tpu.matmul %117, %118, %cst_37 {dimension_numbers = #tpu.dot_dimension_numbers<[1], [0], [0], [1], [0, 0, 1, 1], [], []>} : vector<16x64xf32>, vector<64x128xf32>, vector<16x128xf32> -> vector<16x128xf32>
    %c0_38 = arith.constant 0 : index
    %c0_39 = arith.constant 0 : index
    %120 = vector.load %arg3[%c0_38, %c0_39] : memref<1x128xf32, #tpu.memory_space<vmem>>, vector<1x128xf32>
    %121 = vector.broadcast %120 : vector<1x128xf32> to vector<16x128xf32>
    %122 = arith.addf %119, %121 : vector<16x128xf32>
    %c0_40 = arith.constant 0 : index
    %c0_41 = arith.constant 0 : index
    %123 = vector.load %arg4[%c0_40, %c0_41] : memref<16x128xf32, #tpu.memory_space<vmem>>, vector<16x128xf32>
    tpu.vector_store %arg4[%c0_40, %c0_41], %122 {strides = array<i32>} : memref<16x128xf32, #tpu.memory_space<vmem>>, vector<16x128xf32>,
    return
  }
}

</mosaic_0001>

<bundles_post_ra>
// kernel: tpu_custom_call.1
= control target key start
LH: loop header
LB: loop body
LE: loop exit
PB: predicated region body
PF: predicated region fallthrough
CT: control target
= control target key end

     0   :  { %9 = vsyncpa [#allocation3], 0  ;;  %s2124_s0 = inlined_call_operand.hbm [shape: f32[16,32], index: 0, kind: input, shape index: {}]   ;;  %s2125_s1 = inlined_call_operand.hbm [shape: f32[32,192], index: 1, kind: input, shape index: {}]   ;;  %s2126_s2 = inlined_call_operand.hbm [shape: f32[64,128], index: 2, kind: input, shape index: {}]   ;;  %s2127_s3 = inlined_call_operand.vmem [shape: f32[1,128], index: 3, kind: input, shape index: {}]   ;;  %s2128_s4 = inlined_call_operand.hbm [shape: f32[16,128], index: 4, kind: output, shape index: {}]  }
   0x1   :  { %10 = vsyncpa [#allocation6], 0 }
   0x2   :  { %11 = vsyncpa [#allocation4], 0  ;;  %s1921_s15 = smov [#allocation5]  }
   0x3   :  { %s29_s16 = sshll.u32 %s1921_s15, 4  ;;  %s30_s16 = int_to_ptr.vmem [resolvable:$true] %s29_s16 }
   0x4   :  { %s1843_s17 = scalar_lea.vmem %s30_s16, 1024  ;;  %p1848_p1 = scmp.lt.s32.totalorder %s30_s16, %s30_s16 }
   0x5   :  { %p1844_p0 = scmp.ne.s32.totalorder %s30_s16, %s1843_s17  ;;  %p1849_p2 = scmp.lt.s32.totalorder %s1843_s17, %s1843_s17 }
   0x7   :  { %p1850_p3 = por %p1849_p2, %p1848_p1 }
   0x9   :  { %p1851_p4 = pnand %p1850_p3, %p1844_p0 }
   0xb   :  { %1854 = shalt.err (!%p1851_p4)
}
   0xc   :  { %s1922_s18 = smov 256   ;;  %s1923_s19 = smov 16  }
   0xd   :  { %35 = dma.hbm_to_vmem [thread:$0]  %s2125_s1, 1024, %s30_s16, [#allocation6], %s1922_s18, %s1922_s18, %s1923_s19  }
   0xe   :  { %s1924_s22 = smov [#allocation2]  }
   0xf   :  { %s17_s23 = sshll.u32 %s1924_s22, 4  ;;  %s18_s23 = int_to_ptr.vmem [resolvable:$true] %s17_s23 }
  0x10   :  { %s1863_s24 = scalar_lea.vmem %s18_s23, 256  ;;  %p1868_p6 = scmp.lt.s32.totalorder %s18_s23, %s18_s23 }
  0x11   :  { %p1864_p5 = scmp.ne.s32.totalorder %s18_s23, %s1863_s24  ;;  %p1869_p7 = scmp.lt.s32.totalorder %s1863_s24, %s1863_s24 }
  0x13   :  { %p1870_p8 = por %p1869_p7, %p1868_p6 }
  0x15   :  { %p1871_p9 = pnand %p1870_p8, %p1864_p5 }
  0x17   :  { %1874 = shalt.err (!%p1871_p9)
}
  0x18   :  { %s1925_s25 = smov 128   ;;  %s1926_s26 = smov 8  }
  0x19   :  { %23 = dma.hbm_to_vmem [thread:$0]  %s2124_s0, 256, %s18_s23, [#allocation3], %s1925_s25, %s1925_s25, %s1926_s26  }
  0x1a   :  { %s1927_s1 = smov [#allocation7]  }
  0x1b   :  { %s41_s29 = sshll.u32 %s1927_s1, 4  ;;  %s42_s29 = int_to_ptr.vmem [resolvable:$true] %s41_s29 }
  0x1c   :  { %s1883_s30 = scalar_lea.vmem %s42_s29, 1024  ;;  %p1888_p11 = scmp.lt.s32.totalorder %s42_s29, %s42_s29 }
  0x1d   :  { %p1884_p10 = scmp.ne.s32.totalorder %s42_s29, %s1883_s30  ;;  %p1889_p12 = scmp.lt.s32.totalorder %s1883_s30, %s1883_s30 }
  0x1f   :  { %p1890_p13 = por %p1889_p12, %p1888_p11 }
  0x21   :  { %p1891_p0 = pnand %p1890_p13, %p1884_p10 }
  0x23   :  { %1894 = shalt.err (!%p1891_p0)
}
  0x24   :  { %47 = dma.hbm_to_vmem [thread:$0]  %s2126_s2, 1024, %s42_s29, [#allocation6], %s1925_s25, %s1925_s25, %s1926_s26  }
  0x25   :  { %1915 = dma.done.wait [#allocation3], 256  }
  0x26   :  { %1916 = vsyncadd [#allocation3], 4294967040 }
  0x27   :  { %1917 = dma.done.wait [#allocation6], 2048  }
  0x28   :  { %1918 = vsyncadd [#allocation6], 4294965248  ;;  %v1928_v0 = vmov 0.0   ;;  %v68_v1 = vld [vmem:[#allocation5 + $0x38] sm:$0xff]  ;;  %v67_v2 = vld [vmem:[#allocation5 + $0x30] sm:$0xff]  ;;  %vm69_vm0 = vcmask 261120  }
  0x29   :  { %140 = vmatprep.mubr.f32.mxu0 %v1928_v0  ;;  %1693 = vmatprep.subr.mxu1 %v1928_v0  ;;  %v66_v3 = vld [vmem:[#allocation5 + $0x28] sm:$0xff]  ;;  %v65_v4 = vld [vmem:[#allocation5 + $0x20] sm:$0xff]  ;;  %v64_v5 = vld [vmem:[#allocation5 + $0x18] sm:$0xff]  ;;  %vm1929_vm1 = vmmov 0   ;;  %s1930_s0 = smov 48   ;;  %s1931_s2 = smov 64  }
  0x2a   :  { %100 = vmatprep.subr.mxu0 %v68_v1  ;;  %v63_v6 = vld [vmem:[#allocation5 + $0x10] sm:$0xff]  ;;  %v62_v7 = vld [vmem:[#allocation5 + $0x8] sm:$0xff]  ;;  %v61_v8 = vld [vmem:[#allocation5] sm:$0xff]  ;;  %1695 = vmatprep.mubr.msk.f32.mxu1 %vm1929_vm1, %v1928_v0  ;;  %s1932_s7 = smov 112   ;;  %s1933_s8 = smov 32   ;;  %vm156_vm2 = vcmask 130048  }
  0x2b   :  { %101 = vmatpush1.msra.mxu0 %v67_v2  ;;  %v59_v9 = vld [vmem:[#allocation2] sm:$0xff]  ;;  %v60_v10 = vld [vmem:[#allocation2 + $0x8] sm:$0xff]  ;;  %s1934_s9 = smov 96   ;;  %vm231_vm3 = vcmask 64512   ;;  %s1935_s10 = smov 80   ;;  %vm826_vm4 = vcmask 392192  }
  0x2c   :  { %102 = vmatprep.subr.mxu0 %v66_v3  ;;  %vm1515_vm5 = vcmask 523264   ;;  %s1936_s13 = smov [#allocation8]  }
  0x2d   :  { %103 = vmatpush1.msra.mxu0 %v65_v4  ;;  %s1604_s14 = sshll.u32 %s1936_s13, 4  ;;  %s1605_s14 = int_to_ptr.vmem [resolvable:$true] %s1604_s14 }
  0x2e   :  { %104 = vmatprep.subr.mxu0 %v64_v5  ;;  %s1895_s15 = scalar_lea.vmem %s1605_s14, 256  ;;  %p1900_p2 = scmp.lt.s32.totalorder %s1605_s14, %s1605_s14 }
  0x2f   :  { %105 = vmatpush1.msra.mxu0 %v63_v6  ;;  %p1896_p1 = scmp.ne.s32.totalorder %s1605_s14, %s1895_s15  ;;  %p1901_p3 = scmp.lt.s32.totalorder %s1895_s15, %s1895_s15 }
  0x30   :  { %106 = vmatprep.subr.mxu0 %v62_v7 }
  0x31   :  { %107 = vmatpush1.msra.mxu0 %v61_v8  ;;  %p1902_p4 = por %p1901_p3, %p1900_p2 }
  0x32   :  { %1617 = vmatmul.mubr.msk.f32.vlgmr.msra.gmra.mxu0 %vm69_vm0, %v59_v9  ;;  %1688 = vmatprep.subr.mxu0 %v1928_v0 }
  0x33   :  { %146 = vmatprep.mubr.f32.mxu0 %v1928_v0  ;;  %p1903_p5 = pnand %p1902_p4, %p1896_p1 }
  0x36   :  { %1618 = vmatmul.mubr.msk.f32.gmra.mxu0 %vm69_vm0, %v60_v10 }
  0x37   :  { %1690 = vmatprep.mubr.msk.f32.mxu0 %vm1929_vm1, %v1928_v0 }
  0xf2   :  { %v142_v11 = vpop.f32.mrf.mxu0 }
  0xf3   :  { %318 = vrot.lane.b32.xlu1 %v142_v11, %s1930_s0  ;;  %154 = vrot.lane.b32.xlu0 %v142_v11, %s1931_s2 }
  0xf4   :  { %v1990_v12 = vpop.f32.mrf.mxu0 }
  0xf5   :  { %1694 = vmatpush3.msra.mxu1 %v1990_v12 }
  0xf6   :  { %1698 = vmatprep.subr.mxu1 %v1928_v0  ;;  %v148_v14 = vpop.f32.mrf.mxu0 }
  0xf7   :  { %316 = vrot.lane.b32.xlu1 %v142_v11, %s1932_s7 }
  0xf8   :  { %v2003_v15 = vpop.f32.mrf.mxu0 }
  0xfb   :  { %484 = vrot.lane.b32.xlu1 %v142_v11, %s1933_s8 }
  0xff   :  { %482 = vrot.lane.b32.xlu1 %v142_v11, %s1934_s9 }
 0x103   :  { %649 = vrot.lane.b32.xlu1 %v142_v11, %s1923_s19 }
 0x165   :  { %v155_v13 = vpop.permute.xlu0 %154  ;;  %v319_v24 = vpop.permute.xlu1 %318 }
 0x166   :  { %1689 = vmatpush3.xpose.msk.msra.mxu0 %vm156_vm2, %v155_v13 }
 0x167   :  { %1703 = vmatprep.subr.mxu0 %v1928_v0 }
 0x169   :  { %1691 = vmatmul.mubr.msk.f32.vlgmr.msra.gmra.mxu0 %vm156_vm2, %v142_v11  ;;  %v317_v25 = vpop.permute.xlu1 %316 }
 0x16a   :  { %1705 = vmatprep.mubr.msk.f32.mxu0 %vm1929_vm1, %v1928_v0 }
 0x16d   :  { %v485_v26 = vpop.permute.xlu1 %484 }
 0x171   :  { %v483_v27 = vpop.permute.xlu1 %482 }
 0x175   :  { %v650_v28 = vpop.permute.xlu1 %649 }
 0x229   :  { %v227_v16 = vpop.f32.mrf.mxu0 }
 0x22a   :  { %v232_v17 = vsel %vm231_vm3, %v227_v16, -inf }
 0x22b   :  { %233 = vmax.xlane.f32.xlu0 %v232_v17  ;;  %v1692_v18 = vpop.f32.mrf.mxu0 }
 0x241   :  { %647 = vrot.lane.b32.xlu0 %v142_v11, %s1935_s10 }
 0x245   :  { %1322 = vrot.lane.b32.xlu0 %v148_v14, %s1923_s19 }
 0x2b4   :  { %v234_v19 = vpop.xlane.xlu0 %233 }
 0x2b5   :  { %v235_v20 = vsub.f32 %v227_v16, %v234_v19 }
 0x2b7   :  { %v236_v21 = vmul.f32 1.442695, %v235_v20 }
 0x2b8   :  { %v648_v35 = vpop.permute.xlu0 %647 }
 0x2b9   :  { %1803 = vpow2.f32 %v236_v21 }
 0x2bc   :  { %v1323_v38 = vpop.permute.xlu0 %1322 }
 0x2c6   :  { %v1804_v22 = vpop.eup %1803 }
 0x2c7   :  { %v238_v23 = vsel %vm231_vm3, %v1804_v22, 0.0 }
 0x2c8   :  { %239 = vadd.xlane.f32.xlu1 %v238_v23 }
 0x2d9   :  { %829 = vrot.lane.b32.xlu1 %v148_v14, %s1931_s2 }
 0x2dd   :  { %991 = vrot.lane.b32.xlu1 %v148_v14, %s1930_s0 }
 0x2e1   :  { %989 = vrot.lane.b32.xlu1 %v148_v14, %s1932_s7 }
 0x2e5   :  { %1157 = vrot.lane.b32.xlu1 %v148_v14, %s1933_s8 }
 0x2e9   :  { %1155 = vrot.lane.b32.xlu1 %v148_v14, %s1934_s9 }
 0x2ed   :  { %1320 = vrot.lane.b32.xlu1 %v148_v14, %s1935_s10 }
 0x351   :  { %v240_v29 = vpop.xlane.xlu1 %239 }
 0x352   :  { %1805 = vrcp.f32 %v240_v29 }
 0x355   :  { %v830_v31 = vpop.permute.xlu1 %829 }
 0x359   :  { %v992_v33 = vpop.permute.xlu1 %991 }
 0x35d   :  { %v990_v34 = vpop.permute.xlu1 %989 }
 0x35f   :  { %v1806_v30 = vpop.eup %1805 }
 0x360   :  { %v242_v32 = vmul.f32 %v1806_v30, %v1804_v22 }
 0x361   :  { %v1158_v36 = vpop.permute.xlu1 %1157 }
 0x362   :  { %1696 = vmatmul.mubr.msk.f32.vlgmr.msra.gmra.mxu1 %vm231_vm3, %v242_v32 }
 0x363   :  { %1699 = vmatpush3.xpose.msk.msra.mxu1 %vm156_vm2, %v319_v24  ;;  %1700 = vmatprep.mubr.msk.f32.mxu1 %vm1929_vm1, %v1928_v0 }
 0x364   :  { %1708 = vmatprep.subr.mxu1 %v1928_v0 }
 0x365   :  { %v1156_v37 = vpop.permute.xlu1 %1155 }
 0x366   :  { %1701 = vmatmul.mubr.msk.f32.vlgmr.msra.gmra.mxu1 %vm156_vm2, %v317_v25 }
 0x367   :  { %1709 = vmatpush3.xpose.msk.msra.mxu1 %vm156_vm2, %v485_v26  ;;  %1710 = vmatprep.mubr.msk.f32.mxu1 %vm1929_vm1, %v1928_v0 }
 0x368   :  { %1718 = vmatprep.subr.mxu1 %v1928_v0 }
 0x369   :  { %v1321_v39 = vpop.permute.xlu1 %1320 }
 0x36a   :  { %1711 = vmatmul.mubr.msk.f32.vlgmr.msra.gmra.mxu1 %vm156_vm2, %v483_v27 }
 0x36b   :  { %1719 = vmatpush3.xpose.msk.msra.mxu1 %vm156_vm2, %v650_v28  ;;  %1720 = vmatprep.mubr.msk.f32.mxu1 %vm1929_vm1, %v1928_v0 }
 0x36c   :  { %1728 = vmatprep.subr.mxu1 %v1928_v0 }
 0x36e   :  { %1721 = vmatmul.mubr.msk.f32.vlgmr.msra.gmra.mxu1 %vm156_vm2, %v648_v35 }
 0x36f   :  { %1729 = vmatpush3.xpose.msk.msra.mxu1 %vm156_vm2, %v830_v31  ;;  %1730 = vmatprep.mubr.msk.f32.mxu1 %vm1929_vm1, %v1928_v0 }
 0x370   :  { %1738 = vmatprep.subr.mxu1 %v1928_v0 }
 0x372   :  { %1731 = vmatmul.mubr.msk.f32.vlgmr.msra.gmra.mxu1 %vm156_vm2, %v148_v14 }
 0x373   :  { %1739 = vmatpush3.xpose.msk.msra.mxu1 %vm156_vm2, %v992_v33  ;;  %1740 = vmatprep.mubr.msk.f32.mxu1 %vm1929_vm1, %v1928_v0 }
 0x374   :  { %1748 = vmatprep.subr.mxu1 %v1928_v0 }
 0x376   :  { %1741 = vmatmul.mubr.msk.f32.vlgmr.msra.gmra.mxu1 %vm156_vm2, %v990_v34 }
 0x377   :  { %1749 = vmatpush3.xpose.msk.msra.mxu1 %vm156_vm2, %v1158_v36  ;;  %1750 = vmatprep.mubr.msk.f32.mxu1 %vm1929_vm1, %v1928_v0 }
 0x378   :  { %1758 = vmatprep.subr.mxu1 %v1928_v0 }
 0x37a   :  { %1751 = vmatmul.mubr.msk.f32.vlgmr.msra.gmra.mxu1 %vm156_vm2, %v1156_v37 }
 0x37b   :  { %1759 = vmatpush3.xpose.msk.msra.mxu1 %vm156_vm2, %v1323_v38  ;;  %1760 = vmatprep.mubr.msk.f32.mxu1 %vm1929_vm1, %v1928_v0 }
 0x37e   :  { %1761 = vmatmul.mubr.msk.f32.vlgmr.msra.gmra.mxu1 %vm156_vm2, %v1321_v39 }
 0x422   :  { %v2050_v40 = vpop.f32.mrf.mxu1 }
 0x424   :  { %v1697_v41 = vpop.f32.mrf.mxu1 }
 0x426   :  { %v390_v42 = vpop.f32.mrf.mxu1 }
 0x427   :  { %v394_v43 = vsel %vm231_vm3, %v390_v42, -inf }
 0x428   :  { %395 = vmax.xlane.f32.xlu0 %v394_v43  ;;  %v1702_v44 = vpop.f32.mrf.mxu1 }
 0x42a   :  { %v556_v45 = vpop.f32.mrf.mxu1 }
 0x42b   :  { %v560_v46 = vsel %vm231_vm3, %v556_v45, -inf }
 0x42c   :  { %561 = vmax.xlane.f32.xlu1 %v560_v46  ;;  %v1712_v47 = vpop.f32.mrf.mxu1 }
 0x42e   :  { %v721_v48 = vpop.f32.mrf.mxu1 }
 0x42f   :  { %v725_v49 = vsel %vm231_vm3, %v721_v48, -inf }
 0x430   :  { %726 = vmax.xlane.f32.xlu0 %v725_v49  ;;  %v1722_v50 = vpop.f32.mrf.mxu1 }
 0x432   :  { %v901_v51 = vpop.f32.mrf.mxu1 }
 0x433   :  { %v905_v52 = vsel %vm231_vm3, %v901_v51, -inf }
 0x434   :  { %906 = vmax.xlane.f32.xlu0 %v905_v52  ;;  %v1732_v53 = vpop.f32.mrf.mxu1 }
 0x436   :  { %v1063_v54 = vpop.f32.mrf.mxu1 }
 0x437   :  { %v1067_v55 = vsel %vm231_vm3, %v1063_v54, -inf }
 0x438   :  { %1068 = vmax.xlane.f32.xlu1 %v1067_v55  ;;  %v1742_v56 = vpop.f32.mrf.mxu1 }
 0x43a   :  { %v1229_v57 = vpop.f32.mrf.mxu1 }
 0x43b   :  { %v1233_v58 = vsel %vm231_vm3, %v1229_v57, -inf }
 0x43c   :  { %1234 = vmax.xlane.f32.xlu0 %v1233_v58  ;;  %v1752_v59 = vpop.f32.mrf.mxu1 }
 0x43e   :  { %v1394_v60 = vpop.f32.mrf.mxu1 }
 0x43f   :  { %v1398_v62 = vsel %vm231_vm3, %v1394_v60, -inf }
 0x440   :  { %v1762_v61 = vpop.f32.mrf.mxu1 }
 0x449   :  { %406 = vrot.lane.b32.xlu1 %v1990_v12, %s1932_s7 }
 0x46d   :  { %1399 = vmax.xlane.f32.xlu1 %v1398_v62 }
 0x47e   :  { %736 = vrot.lane.b32.xlu1 %v1990_v12, %s1935_s10 }
 0x4b1   :  { %v396_v63 = vpop.xlane.xlu0 %395 }
 0x4b2   :  { %v397_v1 = vsub.f32 %v390_v42, %v396_v63 }
 0x4b4   :  { %v398_v2 = vmul.f32 1.442695, %v397_v1 }
 0x4b5   :  { %v562_v3 = vpop.xlane.xlu1 %561 }
 0x4b6   :  { %1807 = vpow2.f32 %v398_v2  ;;  %v563_v4 = vsub.f32 %v556_v45, %v562_v3 }
 0x4b8   :  { %v564_v5 = vmul.f32 1.442695, %v563_v4  ;;  %v1507_v4 = vld [vmem:[#allocation7 + $0x38] sm:$0xff] }
 0x4b9   :  { %v727_v13 = vpop.xlane.xlu0 %726  ;;  %1768 = vmatprep.subr.mxu1 %v1507_v4 }
 0x4ba   :  { %1809 = vpow2.f32 %v564_v5  ;;  %v728_v14 = vsub.f32 %v721_v48, %v727_v13  ;;  %v1506_v5 = vld [vmem:[#allocation7 + $0x30] sm:$0xff]  ;;  %1769 = vmatpush3.msra.mxu1 %v1507_v4 }
 0x4bb   :  { %1770 = vmatprep.subr.mxu1 %v1506_v5 }
 0x4bc   :  { %v729_v18 = vmul.f32 1.442695, %v728_v14  ;;  %1771 = vmatpush3.msra.mxu1 %v1506_v5 }
 0x4bd   :  { %v907_v16 = vpop.xlane.xlu0 %906 }
 0x4be   :  { %v908_v17 = vsub.f32 %v901_v51, %v907_v16  ;;  %1811 = vpow2.f32 %v729_v18 }
 0x4c0   :  { %v909_v21 = vmul.f32 1.442695, %v908_v17 }
 0x4c1   :  { %v1069_v6 = vpop.xlane.xlu1 %1068 }
 0x4c2   :  { %v1070_v19 = vsub.f32 %v1063_v54, %v1069_v6  ;;  %1813 = vpow2.f32 %v909_v21  ;;  %v1505_v6 = vld [vmem:[#allocation7 + $0x28] sm:$0xff] }
 0x4c3   :  { %v1808_v7 = vpop.eup %1807  ;;  %1772 = vmatprep.subr.mxu1 %v1505_v6 }
 0x4c4   :  { %v400_v8 = vsel %vm231_vm3, %v1808_v7, 0.0  ;;  %v1071_v22 = vmul.f32 1.442695, %v1070_v19  ;;  %1773 = vmatpush3.msra.mxu1 %v1505_v6 }
 0x4c5   :  { %v407_v9 = vpop.permute.xlu1 %406  ;;  %401 = vadd.xlane.f32.xlu0 %v400_v8  ;;  %v1235_v20 = vpop.xlane.xlu0 %1234  ;;  %v1502_v8 = vld [vmem:[#allocation7 + $0x10] sm:$0xff] }
 0x4c6   :  { %1704 = vmatpush3.msra.mxu0 %v407_v9  ;;  %v1236_v23 = vsub.f32 %v1229_v57, %v1235_v20  ;;  %1815 = vpow2.f32 %v1071_v22 }
 0x4c7   :  { %v1810_v10 = vpop.eup %1809  ;;  %1713 = vmatprep.subr.mxu0 %v1928_v0 }
 0x4c8   :  { %v566_v11 = vsel %vm231_vm3, %v1810_v10, 0.0  ;;  %v1237_v24 = vmul.f32 1.442695, %v1236_v23 }
 0x4c9   :  { %567 = vadd.xlane.f32.xlu1 %v566_v11  ;;  %v1500_v11 = vld [vmem:[#allocation7] sm:$0xff] }
 0x4ca   :  { %1817 = vpow2.f32 %v1237_v24 }
 0x4cb   :  { %v1812_v25 = vpop.eup %1811 }
 0x4cf   :  { %v1814_v28 = vpop.eup %1813 }
 0x4d0   :  { %v911_v32 = vsel %vm231_vm3, %v1814_v28, 0.0 }
 0x4d3   :  { %v1816_v30 = vpop.eup %1815 }
 0x4d4   :  { %v1073_v31 = vsel %vm231_vm3, %v1816_v30, 0.0 }
 0x4d7   :  { %v1818_v33 = vpop.eup %1817 }
 0x4d8   :  { %v1239_v34 = vsel %vm231_vm3, %v1818_v33, 0.0 }
 0x4da   :  { %1079 = vrot.lane.b32.xlu1 %v2003_v15, %s1932_s7 }
 0x4db   :  { %571 = vrot.lane.b32.xlu0 %v1990_v12, %s1934_s9  ;;  %v731_v12 = vsel %vm231_vm3, %v1812_v25, 0.0 }
 0x4f6   :  { %v1400_v26 = vpop.xlane.xlu1 %1399 }
 0x4f7   :  { %v1401_v27 = vsub.f32 %v1394_v60, %v1400_v26 }
 0x4f9   :  { %v1402_v29 = vmul.f32 1.442695, %v1401_v27 }
 0x4fa   :  { %732 = vadd.xlane.f32.xlu0 %v731_v12  ;;  %v737_v37 = vpop.permute.xlu1 %736 }
 0x4fb   :  { %1819 = vpow2.f32 %v1402_v29 }
 0x4fe   :  { %1074 = vadd.xlane.f32.xlu0 %v1073_v31  ;;  %912 = vadd.xlane.f32.xlu1 %v911_v32 }
 0x502   :  { %1240 = vadd.xlane.f32.xlu1 %v1239_v34  ;;  %v1643_v34 = vld [vmem:[%s2127_s3] ss:$0 sm:$0xff] }
 0x508   :  { %v1820_v35 = vpop.eup %1819 }
 0x509   :  { %v1404_v36 = vsel %vm231_vm3, %v1820_v35, 0.0 }
 0x50a   :  { %1405 = vadd.xlane.f32.xlu0 %v1404_v36 }
 0x513   :  { %1409 = vrot.lane.b32.xlu1 %v2003_v15, %s1935_s10 }
 0x520   :  { %1244 = vrot.lane.b32.xlu0 %v2003_v15, %s1934_s9 }
 0x54e   :  { %v402_v38 = vpop.xlane.xlu0 %401 }
 0x54f   :  { %1821 = vrcp.f32 %v402_v38 }
 0x552   :  { %v568_v39 = vpop.xlane.xlu1 %567  ;;  %v572_v43 = vpop.permute.xlu0 %571 }
 0x553   :  { %1823 = vrcp.f32 %v568_v39 }
 0x556   :  { %v1080_v46 = vpop.permute.xlu1 %1079 }
 0x55c   :  { %v1822_v41 = vpop.eup %1821 }
 0x55d   :  { %v404_v42 = vmul.f32 %v1822_v41, %v1808_v7  ;;  %v1504_v7 = vld [vmem:[#allocation7 + $0x20] sm:$0xff] }
 0x55e   :  { %1774 = vmatprep.subr.mxu1 %v1504_v7 }
 0x55f   :  { %1706 = vmatmul.mubr.msk.f32.vlgmr.msra.gmra.mxu0 %vm231_vm3, %v404_v42  ;;  %1775 = vmatpush3.msra.mxu1 %v1504_v7 }
 0x560   :  { %v1824_v44 = vpop.eup %1823  ;;  %1714 = vmatpush3.msra.mxu0 %v572_v43  ;;  %1715 = vmatprep.mubr.msk.f32.mxu0 %vm1929_vm1, %v1928_v0 }
 0x561   :  { %1723 = vmatprep.subr.mxu0 %v1928_v0  ;;  %v570_v45 = vmul.f32 %v1824_v44, %v1810_v10  ;;  %v1501_v10 = vld [vmem:[#allocation7 + $0x8] sm:$0xff] }
 0x563   :  { %1716 = vmatmul.mubr.msk.f32.vlgmr.msra.gmra.mxu0 %vm231_vm3, %v570_v45 }
 0x564   :  { %1724 = vmatpush3.msra.mxu0 %v737_v37  ;;  %1725 = vmatprep.mubr.msk.f32.mxu0 %vm1929_vm1, %v1928_v0 }
 0x565   :  { %1733 = vmatprep.subr.mxu0 %v1928_v0 }
 0x583   :  { %v733_v47 = vpop.xlane.xlu0 %732 }
 0x584   :  { %1825 = vrcp.f32 %v733_v47 }
 0x587   :  { %v913_v48 = vpop.xlane.xlu1 %912  ;;  %v1075_v49 = vpop.xlane.xlu0 %1074 }
 0x588   :  { %1827 = vrcp.f32 %v913_v48 }
 0x589   :  { %1829 = vrcp.f32 %v1075_v49 }
 0x58b   :  { %v1241_v50 = vpop.xlane.xlu1 %1240 }
 0x58c   :  { %1831 = vrcp.f32 %v1241_v50 }
 0x58f   :  { %v1410_v60 = vpop.permute.xlu1 %1409 }
 0x591   :  { %v1826_v51 = vpop.eup %1825 }
 0x592   :  { %v735_v52 = vmul.f32 %v1826_v51, %v1812_v25 }
 0x593   :  { %v1406_v53 = vpop.xlane.xlu0 %1405 }
 0x594   :  { %1833 = vrcp.f32 %v1406_v53  ;;  %1726 = vmatmul.mubr.msk.f32.vlgmr.msra.gmra.mxu0 %vm231_vm3, %v735_v52 }
 0x595   :  { %v1828_v54 = vpop.eup %1827  ;;  %1734 = vmatpush3.msra.mxu0 %v2003_v15  ;;  %1735 = vmatprep.mubr.msk.f32.mxu0 %vm1929_vm1, %v1928_v0 }
 0x596   :  { %1743 = vmatprep.subr.mxu0 %v1928_v0  ;;  %v915_v55 = vmul.f32 %v1828_v54, %v1814_v28  ;;  %v1830_v56 = vpop.eup %1829 }
 0x597   :  { %v1077_v57 = vmul.f32 %v1830_v56, %v1816_v30  ;;  %v1245_v59 = vpop.permute.xlu0 %1244 }
 0x598   :  { %1736 = vmatmul.mubr.msk.f32.vlgmr.msra.gmra.mxu0 %vm231_vm3, %v915_v55 }
 0x599   :  { %1744 = vmatpush3.msra.mxu0 %v1080_v46  ;;  %1745 = vmatprep.mubr.msk.f32.mxu0 %vm1929_vm1, %v1928_v0  ;;  %v1832_v58 = vpop.eup %1831 }
 0x59a   :  { %1753 = vmatprep.subr.mxu0 %v1928_v0  ;;  %v1243_v15 = vmul.f32 %v1832_v58, %v1818_v33 }
 0x59c   :  { %1746 = vmatmul.mubr.msk.f32.vlgmr.msra.gmra.mxu0 %vm231_vm3, %v1077_v57 }
 0x59d   :  { %1754 = vmatpush3.msra.mxu0 %v1245_v59  ;;  %1755 = vmatprep.mubr.msk.f32.mxu0 %vm1929_vm1, %v1928_v0 }
 0x59e   :  { %1763 = vmatprep.subr.mxu0 %v1928_v0 }
 0x5a0   :  { %1756 = vmatmul.mubr.msk.f32.vlgmr.msra.gmra.mxu0 %vm231_vm3, %v1243_v15 }
 0x5a1   :  { %v1834_v61 = vpop.eup %1833  ;;  %1764 = vmatpush3.msra.mxu0 %v1410_v60  ;;  %1765 = vmatprep.mubr.msk.f32.mxu0 %vm1929_vm1, %v1928_v0  ;;  %v1503_v0 = vld [vmem:[#allocation7 + $0x18] sm:$0xff] }
 0x5a2   :  { %v1408_v62 = vmul.f32 %v1834_v61, %v1820_v35  ;;  %1776 = vmatprep.subr.mxu1 %v1503_v0 }
 0x5a3   :  { %1777 = vmatpush3.msra.mxu1 %v1503_v0 }
 0x5a4   :  { %1766 = vmatmul.mubr.msk.f32.vlgmr.msra.gmra.mxu0 %vm231_vm3, %v1408_v62  ;;  %1778 = vmatprep.subr.mxu1 %v1502_v8 }
 0x5a5   :  { %1779 = vmatpush3.msra.mxu1 %v1502_v8 }
 0x5a6   :  { %1780 = vmatprep.subr.mxu1 %v1501_v10 }
 0x5a7   :  { %1781 = vmatpush3.msra.mxu1 %v1501_v10 }
 0x5a8   :  { %1782 = vmatprep.subr.mxu1 %v1500_v11 }
 0x5a9   :  { %1783 = vmatpush3.msra.mxu1 %v1500_v11 }
 0x61f   :  { %v478_v63 = vpop.f32.mrf.mxu0 }
 0x620   :  { %813 = vrot.lane.b32.xlu0 %v478_v63, %s1923_s19 }
 0x621   :  { %v1707_v1 = vpop.f32.mrf.mxu0 }
 0x623   :  { %v643_v2 = vpop.f32.mrf.mxu0 }
 0x624   :  { %817 = vrot.lane.b32.xlu1 %v643_v2, %s1933_s8 }
 0x625   :  { %v1717_v3 = vpop.f32.mrf.mxu0 }
 0x654   :  { %v808_v9 = vpop.f32.mrf.mxu0 }
 0x655   :  { %821 = vrot.lane.b32.xlu1 %v808_v9, %s1930_s0 }
 0x656   :  { %v1727_v13 = vpop.f32.mrf.mxu0 }
 0x658   :  { %v985_v14 = vpop.f32.mrf.mxu0 }
 0x65a   :  { %v1737_v16 = vpop.f32.mrf.mxu0 }
 0x65c   :  { %v1151_v17 = vpop.f32.mrf.mxu0 }
 0x65d   :  { %1486 = vrot.lane.b32.xlu0 %v1151_v17, %s1923_s19 }
 0x65e   :  { %v1747_v18 = vpop.f32.mrf.mxu0 }
 0x660   :  { %v1316_v19 = vpop.f32.mrf.mxu0 }
 0x661   :  { %1490 = vrot.lane.b32.xlu0 %v1316_v19, %s1933_s8 }
 0x662   :  { %v1757_v20 = vpop.f32.mrf.mxu0 }
 0x664   :  { %v1481_v21 = vpop.f32.mrf.mxu0 }
 0x665   :  { %1494 = vrot.lane.b32.xlu1 %v1481_v21, %s1930_s0 }
 0x666   :  { %v1767_v22 = vpop.f32.mrf.mxu0 }
 0x692   :  { %v814_v23 = vpop.permute.xlu0 %813 }
 0x693   :  { %v824_v25 = vsel %vm156_vm2, %v2050_v40, %v814_v23 }
 0x696   :  { %v818_v24 = vpop.permute.xlu1 %817 }
 0x697   :  { %v825_v26 = vsel %vm69_vm0, %v824_v25, %v818_v24 }
 0x6c7   :  { %v822_v27 = vpop.permute.xlu1 %821 }
 0x6c8   :  { %v827_v28 = vsel %vm826_vm4, %v825_v26, %v822_v27 }
 0x6c9   :  { %1784 = vmatprep.mubr.msk.f32.mxu1 %vm1515_vm5, %v827_v28 }
 0x6cf   :  { %v1487_v29 = vpop.permute.xlu0 %1486 }
 0x6d0   :  { %v1497_v30 = vsel %vm156_vm2, %v985_v14, %v1487_v29 }
 0x6d3   :  { %v1491_v12 = vpop.permute.xlu0 %1490 }
 0x6d4   :  { %v1498_v31 = vsel %vm69_vm0, %v1497_v30, %v1491_v12 }
 0x6d7   :  { %v1495_v32 = vpop.permute.xlu1 %1494 }
 0x6d8   :  { %v1499_v33 = vsel %vm826_vm4, %v1498_v31, %v1495_v32 }
 0x6d9   :  { %1785 = vmatmul.mubr.msk.f32.vlgmr.msra.gmra.mxu1 %vm1515_vm5, %v1499_v33 }
 0x799   :  { %v1786_v40 = vpop.f32.mrf.mxu1 }
 0x79a   :  { %v1594_v35 = vadd.f32 %v1786_v40, %v1643_v34 }
 0x79b   :  { %v1588_v36 = vpop.f32.mrf.mxu1 }
 0x79c   :  { %1598 = vst [vmem:[#allocation8 + $0x8] sm:$0xff] %v1594_v35  ;;  %v1589_v37 = vadd.f32 %v1643_v34, %v1588_v36 }
 0x79e   :  { %1597 = vst [vmem:[#allocation8] sm:$0xff] %v1589_v37 }
 0x79f   :  { %1906 = shalt.err (!%p1903_p5)
}
 0x7a0   :  { %1610 = dma.vmem_to_hbm [thread:$0]  %s1605_s14, 256, %s2128_s4, [#allocation4], %s1925_s25, %s1925_s25, %s1926_s26  }
 0x7a1   :  { %1919 = dma.done.wait [#allocation4], 256  }
 0x7a2   :  { %1920 = vsyncadd [#allocation4], 4294967040 }
 0x7a3   :  { %1614 = vsyncpa [#allocation3], 1 }
 0x7a4   :  { %1615 = vsyncpa [#allocation6], 1 }
 0x7a5   :  { %1616 = vsyncpa [#allocation4], 1 }

</bundles_post_ra>
